<compile_context>
chip_gen: v7x
topology: tpu7x:2x2x1
jax: 0.10.0
libtpu: 0.0.40
codegen_flags: <defaults>
</compile_context>

<pallas_src>
import jax
import jax.numpy as jnp
from jax.experimental import pallas as pl
from jax.experimental.pallas import tpu as pltpu

LANE = 128  # TPU lane width


def gcn_kernel(adj_ref, x_ref, w1_ref, b1_ref, w2_ref, b2_ref, out_ref):
    """Fused 2-layer GCN forward for one graph (one grid step).

    adj_ref : [1, N, N]   bf16 normalized adjacency (D^-1/2 A D^-1/2)
    x_ref   : [1, N, Fp]  bf16 node features (lane-padded)
    w1_ref  : [Fp, Hp] bf16    b1_ref : [1, Hp] f32
    w2_ref  : [Hp, Ep] bf16    b2_ref : [1, Ep] f32
    out_ref : [1, N, Ep]  f32  (lane-padded; wrapper slices real emb cols)
    """
    adj = adj_ref[0]                                            # [N, N]  bf16
    x = x_ref[0]                                                # [N, Fp] bf16

    # ---- layer 1 (in_feats < hid_feats): aggregate-then-project -----------
    #   h1 = relu((adj @ x) @ w1 + b1)
    agg1 = jnp.dot(adj, x, preferred_element_type=jnp.float32)  # [N, Fp] f32
    h1 = jnp.dot(agg1.astype(jnp.bfloat16), w1_ref[...],
                 preferred_element_type=jnp.float32)            # [N, Hp] f32
    h1 = jnp.maximum(h1 + b1_ref[...], 0.0)                     # bias + ReLU in f32 (VPU)
    # dropout(p=0.2): identity in eval/inference mode.
    # TODO(synk): training-mode dropout would use pltpu.prng_seed + pltpu.stateful_bernoulli.

    # ---- layer 2 (hid_feats > emb_feats): project-then-aggregate ----------
    #   out = adj @ (h1 @ w2) + b2
    hw2 = jnp.dot(h1.astype(jnp.bfloat16), w2_ref[...],
                  preferred_element_type=jnp.float32)           # [N, Ep] f32
    out = jnp.dot(adj, hw2.astype(jnp.bfloat16),
                  preferred_element_type=jnp.float32) + b2_ref[...]
    out_ref[0] = out.astype(out_ref.dtype)


def _pad_axis(a, axis, size):
    pad = size - a.shape[axis]
    if pad <= 0:
        return a
    widths = [(0, 0)] * a.ndim
    widths[axis] = (0, pad)
    return jnp.pad(a, widths)


def _round_up(v, m):
    return ((v + m - 1) // m) * m


def gcn_forward(adj_norm, x, w1, b1, w2, b2):
    """Batched 2-layer GCN forward.

    adj_norm : [G, N, N] f32   x : [G, N, F] f32
    w1 : [F, H]  b1 : [H]      w2 : [H, E]  b2 : [E]
    returns  : [G, N, E] f32
    """
    g, n, f_in = x.shape
    hid = w1.shape[1]
    emb = w2.shape[1]

    fp = _round_up(f_in, LANE)
    hp = _round_up(hid, LANE)
    ep = _round_up(emb, LANE)

    # bf16 MXU operands (halves HBM->VMEM bytes); biases stay f32 for the VPU add.
    adj_bf = adj_norm.astype(jnp.bfloat16)
    x_p = _pad_axis(x, 2, fp).astype(jnp.bfloat16)
    w1_p = _pad_axis(_pad_axis(w1, 0, fp), 1, hp).astype(jnp.bfloat16)
    w2_p = _pad_axis(_pad_axis(w2, 0, hp), 1, ep).astype(jnp.bfloat16)
    b1_p = _pad_axis(b1.reshape(1, -1).astype(jnp.float32), 1, hp)
    b2_p = _pad_axis(b2.reshape(1, -1).astype(jnp.float32), 1, ep)

    out_padded = pl.pallas_call(
        gcn_kernel,
        out_shape=jax.ShapeDtypeStruct((g, n, ep), jnp.float32),
        grid=(g,),
        in_specs=[
            pl.BlockSpec((1, n, n), lambda i: (i, 0, 0)),    # adjacency (per graph)
            pl.BlockSpec((1, n, fp), lambda i: (i, 0, 0)),   # features (per graph)
            pl.BlockSpec((fp, hp), lambda i: (0, 0)),        # W1 (shared)
            pl.BlockSpec((1, hp), lambda i: (0, 0)),         # b1 (shared)
            pl.BlockSpec((hp, ep), lambda i: (0, 0)),        # W2 (shared)
            pl.BlockSpec((1, ep), lambda i: (0, 0)),         # b2 (shared)
        ],
        out_specs=pl.BlockSpec((1, n, ep), lambda i: (i, 0, 0)),
        compiler_params=pltpu.CompilerParams(
            dimension_semantics=("parallel",)),
    )(adj_bf, x_p, w1_p, b1_p, w2_p, b2_p)

    return out_padded[:, :, :emb]


def build_normalized_adjacency(key, n):
    """Random symmetric graph with self-loops, then D^{-1/2} A D^{-1/2}."""
    a = jax.random.bernoulli(key, p=0.15, shape=(n, n)).astype(jnp.float32)
    a = jnp.maximum(a, a.T)                             # symmetrize (undirected)
    a = jnp.maximum(a, jnp.eye(n, dtype=jnp.float32))   # add self-loops
    deg = jnp.sum(a, axis=1)                            # degree per node (>= 1)
    d_inv_sqrt = 1.0 / jnp.sqrt(deg)
    return a * d_inv_sqrt[:, None] * d_inv_sqrt[None, :]


if __name__ == "__main__":
    # Small, deterministic problem: batch of 4 graphs, 64 nodes, in=16, hid=32, emb=8.
    G, N, IN_FEATS, HID_FEATS, EMB_FEATS = 4, 64, 16, 32, 8

    key = jax.random.PRNGKey(0)
    k_adj, k_x, k_w1, k_w2, k_b1, k_b2 = jax.random.split(key, 6)

    adj_norm = jax.vmap(build_normalized_adjacency, in_axes=(0, None))(
        jax.random.split(k_adj, G), N)                                   # [G, N, N]
    x = jax.random.normal(k_x, (G, N, IN_FEATS), dtype=jnp.float32)      # [G, N, F]

    # Deterministic Glorot-style weights; small nonzero biases.
    lim1 = (6.0 / (IN_FEATS + HID_FEATS)) ** 0.5
    lim2 = (6.0 / (HID_FEATS + EMB_FEATS)) ** 0.5
    w1 = jax.random.uniform(k_w1, (IN_FEATS, HID_FEATS), jnp.float32,
                            minval=-lim1, maxval=lim1)
    w2 = jax.random.uniform(k_w2, (HID_FEATS, EMB_FEATS), jnp.float32,
                            minval=-lim2, maxval=lim2)
    b1 = 0.01 * jax.random.normal(k_b1, (HID_FEATS,), jnp.float32)
    b2 = 0.01 * jax.random.normal(k_b2, (EMB_FEATS,), jnp.float32)

    out = gcn_forward(adj_norm, x, w1, b1, w2, b2)
    out = jax.block_until_ready(out)

    # Pure-JAX f32 reference (same math, original contraction order).
    h1_ref = jnp.maximum(
        jnp.einsum("gnm,gmf->gnf", adj_norm, x) @ w1 + b1[None, None, :], 0.0)
    out_ref = jnp.einsum("gnm,gmf->gnf", adj_norm, h1_ref @ w2) + b2[None, None, :]

    assert out.shape == (G, N, EMB_FEATS)
    # bf16 MXU inputs -> loosen tolerance vs f32 reference.
    assert jnp.allclose(out, out_ref, atol=5e-2, rtol=5e-2), (
        float(jnp.max(jnp.abs(out - out_ref))))

    print("KERNEL_OK")
</pallas_src>

<mosaic_0001>
module attributes {stable_mosaic.version = 11 : i64} {
  func.func @gcn_kernel(%arg0: i32, %arg1: memref<1x64x64xbf16, #tpu.memory_space<vmem>>, %arg2: memref<1x64x128xbf16, #tpu.memory_space<vmem>>, %arg3: memref<128x128xbf16, #tpu.memory_space<vmem>>, %arg4: memref<1x128xf32, #tpu.memory_space<vmem>>, %arg5: memref<128x128xbf16, #tpu.memory_space<vmem>>, %arg6: memref<1x128xf32, #tpu.memory_space<vmem>>, %arg7: memref<1x64x128xf32, #tpu.memory_space<vmem>>) attributes {dimension_semantics = [#tpu.dimension_semantics<parallel>], iteration_bounds = array<i64: 4>, scalar_prefetch = 0 : i64, scratch_operands = 0 : i64, tpu.core_type = #tpu.core_type<tc>, window_params = [{transform_indices = @transform_0, window_bounds = array<i64: 1, 64, 64>}, {transform_indices = @transform_1, window_bounds = array<i64: 1, 64, 128>}, {pipeline_mode = #tpu.pipeline_mode<synchronous>, transform_indices = @transform_2, window_bounds = array<i64: 128, 128>}, {pipeline_mode = #tpu.pipeline_mode<synchronous>, transform_indices = @transform_3, window_bounds = array<i64: 1, 128>}, {pipeline_mode = #tpu.pipeline_mode<synchronous>, transform_indices = @transform_4, window_bounds = array<i64: 128, 128>}, {pipeline_mode = #tpu.pipeline_mode<synchronous>, transform_indices = @transform_5, window_bounds = array<i64: 1, 128>}, {transform_indices = @transform_6, window_bounds = array<i64: 1, 64, 128>}]} {
    %c0 = arith.constant 0 : index
    %c0_0 = arith.constant 0 : index
    %c0_1 = arith.constant 0 : index
    %0 = vector.load %arg1[%c0, %c0_0, %c0_1] : memref<1x64x64xbf16, #tpu.memory_space<vmem>>, vector<1x64x64xbf16>
    %1 = vector.shape_cast %0 : vector<1x64x64xbf16> to vector<64x64xbf16>
    %c0_2 = arith.constant 0 : index
    %c0_3 = arith.constant 0 : index
    %c0_4 = arith.constant 0 : index
    %2 = vector.load %arg2[%c0_2, %c0_3, %c0_4] : memref<1x64x128xbf16, #tpu.memory_space<vmem>>, vector<1x64x128xbf16>
    %3 = vector.shape_cast %2 : vector<1x64x128xbf16> to vector<64x128xbf16>
    %cst = arith.constant dense<0.000000e+00> : vector<64x128xf32>
    %4 = tpu.matmul %1, %3, %cst {dimension_numbers = #tpu.dot_dimension_numbers<[1], [0], [0], [1], [0, 0, 1, 1], [], []>} : vector<64x64xbf16>, vector<64x128xbf16>, vector<64x128xf32> -> vector<64x128xf32>
    %5 = arith.truncf %4 : vector<64x128xf32> to vector<64x128xbf16>
    %c0_5 = arith.constant 0 : index
    %c0_6 = arith.constant 0 : index
    %6 = vector.load %arg3[%c0_5, %c0_6] : memref<128x128xbf16, #tpu.memory_space<vmem>>, vector<128x128xbf16>
    %cst_7 = arith.constant dense<0.000000e+00> : vector<64x128xf32>
    %7 = tpu.matmul %5, %6, %cst_7 {dimension_numbers = #tpu.dot_dimension_numbers<[1], [0], [0], [1], [0, 0, 1, 1], [], []>} : vector<64x128xbf16>, vector<128x128xbf16>, vector<64x128xf32> -> vector<64x128xf32>
    %c0_8 = arith.constant 0 : index
    %c0_9 = arith.constant 0 : index
    %8 = vector.load %arg4[%c0_8, %c0_9] : memref<1x128xf32, #tpu.memory_space<vmem>>, vector<1x128xf32>
    %9 = vector.broadcast %8 : vector<1x128xf32> to vector<64x128xf32>
    %10 = arith.addf %7, %9 : vector<64x128xf32>
    %cst_10 = arith.constant 0.000000e+00 : f32
    %11 = vector.broadcast %cst_10 : f32 to vector<64x128xf32>
    %12 = arith.maximumf %10, %11 : vector<64x128xf32>
    %13 = arith.truncf %12 : vector<64x128xf32> to vector<64x128xbf16>
    %c0_11 = arith.constant 0 : index
    %c0_12 = arith.constant 0 : index
    %14 = vector.load %arg5[%c0_11, %c0_12] : memref<128x128xbf16, #tpu.memory_space<vmem>>, vector<128x128xbf16>
    %cst_13 = arith.constant dense<0.000000e+00> : vector<64x128xf32>
    %15 = tpu.matmul %13, %14, %cst_13 {dimension_numbers = #tpu.dot_dimension_numbers<[1], [0], [0], [1], [0, 0, 1, 1], [], []>} : vector<64x128xbf16>, vector<128x128xbf16>, vector<64x128xf32> -> vector<64x128xf32>
    %16 = arith.truncf %15 : vector<64x128xf32> to vector<64x128xbf16>
    %cst_14 = arith.constant dense<0.000000e+00> : vector<64x128xf32>
    %17 = tpu.matmul %1, %16, %cst_14 {dimension_numbers = #tpu.dot_dimension_numbers<[1], [0], [0], [1], [0, 0, 1, 1], [], []>} : vector<64x64xbf16>, vector<64x128xbf16>, vector<64x128xf32> -> vector<64x128xf32>
    %c0_15 = arith.constant 0 : index
    %c0_16 = arith.constant 0 : index
    %18 = vector.load %arg6[%c0_15, %c0_16] : memref<1x128xf32, #tpu.memory_space<vmem>>, vector<1x128xf32>
    %19 = vector.broadcast %18 : vector<1x128xf32> to vector<64x128xf32>
    %20 = arith.addf %17, %19 : vector<64x128xf32>
    %c0_17 = arith.constant 0 : index
    %c0_18 = arith.constant 0 : index
    %c0_19 = arith.constant 0 : index
    %21 = vector.load %arg7[%c0_17, %c0_18, %c0_19] : memref<1x64x128xf32, #tpu.memory_space<vmem>>, vector<1x64x128xf32>
    %22 = vector.shape_cast %21 : vector<1x64x128xf32> to vector<64x128xf32>
    %23 = vector.shape_cast %20 : vector<64x128xf32> to vector<1x64x128xf32>
    tpu.vector_store %arg7[%c0_17, %c0_18, %c0_19], %23 {strides = array<i32>} : memref<1x64x128xf32, #tpu.memory_space<vmem>>, vector<1x64x128xf32>,
    return
  }
  func.func @transform_0(%arg0: i32) -> (i32, i32, i32) {
    %c0_i32 = arith.constant 0 : i32
    %c0_i32_0 = arith.constant 0 : i32
    %c0_i32_1 = arith.constant 0 : i32
    return %arg0, %c0_i32, %c0_i32_0 : i32, i32, i32
  }
  func.func @transform_1(%arg0: i32) -> (i32, i32, i32) {
    %c0_i32 = arith.constant 0 : i32
    %c0_i32_0 = arith.constant 0 : i32
    %c0_i32_1 = arith.constant 0 : i32
    return %arg0, %c0_i32, %c0_i32_0 : i32, i32, i32
  }
  func.func @transform_2(%arg0: i32) -> (i32, i32) {
    %c0_i32 = arith.constant 0 : i32
    %c0_i32_0 = arith.constant 0 : i32
    %c0_i32_1 = arith.constant 0 : i32
    return %c0_i32, %c0_i32_0 : i32, i32
  }
  func.func @transform_3(%arg0: i32) -> (i32, i32) {
    %c0_i32 = arith.constant 0 : i32
    %c0_i32_0 = arith.constant 0 : i32
    %c0_i32_1 = arith.constant 0 : i32
    return %c0_i32, %c0_i32_0 : i32, i32
  }
  func.func @transform_4(%arg0: i32) -> (i32, i32) {
    %c0_i32 = arith.constant 0 : i32
    %c0_i32_0 = arith.constant 0 : i32
    %c0_i32_1 = arith.constant 0 : i32
    return %c0_i32, %c0_i32_0 : i32, i32
  }
  func.func @transform_5(%arg0: i32) -> (i32, i32) {
    %c0_i32 = arith.constant 0 : i32
    %c0_i32_0 = arith.constant 0 : i32
    %c0_i32_1 = arith.constant 0 : i32
    return %c0_i32, %c0_i32_0 : i32, i32
  }
  func.func @transform_6(%arg0: i32) -> (i32, i32, i32) {
    %c0_i32 = arith.constant 0 : i32
    %c0_i32_0 = arith.constant 0 : i32
    %c0_i32_1 = arith.constant 0 : i32
    return %arg0, %c0_i32, %c0_i32_0 : i32, i32, i32
  }
}

</mosaic_0001>

<bundles_post_ra>
// kernel: tpu_custom_call.1
= control target key start
LH: loop header
LB: loop body
LE: loop exit
PB: predicated region body
PF: predicated region fallthrough
CT: control target
= control target key end

     0   :  { %s1811_s0 = inlined_call_operand.hbm [shape: bf16[4,64,64], index: 0, kind: input, shape index: {}]   ;;  %s1812_s1 = inlined_call_operand.hbm [shape: bf16[4,64,128], index: 1, kind: input, shape index: {}]   ;;  %s1813_s2 = inlined_call_operand.hbm [shape: bf16[128,128], index: 2, kind: input, shape index: {}]   ;;  %s1814_s3 = inlined_call_operand.vmem [shape: f32[1,128], index: 3, kind: input, shape index: {}]   ;;  %s1815_s4 = inlined_call_operand.hbm [shape: bf16[128,128], index: 4, kind: input, shape index: {}]   ;;  %s1816_s5 = inlined_call_operand.vmem [shape: f32[1,128], index: 5, kind: input, shape index: {}]   ;;  %s1817_s6 = inlined_call_operand.hbm [shape: f32[4,64,128], index: 6, kind: output, shape index: {}]  }
   0x1   :  { %1825 = sst [smem:[#allocation16_spill]] %s1811_s0 }
   0x2   :  { %1826 = sst [smem:[#allocation17_spill]] %s1813_s2 }
   0x3   :  { %1827 = sst [smem:[#allocation18_spill]] %s1815_s4 }
   0x4   :  { %11 = vsyncpa [#allocation3], 0 }
   0x5   :  { %13 = vsyncpa [#allocation3 + $0x1], 0 }
   0x6   :  { %14 = vsyncpa [#allocation6], 0 }
   0x7   :  { %16 = vsyncpa [#allocation6 + $0x1], 0 }
   0x8   :  { %17 = vsyncpa [#allocation9], 0 }
   0x9   :  { %18 = vsyncpa [#allocation4], 0 }
   0xa   :  { %20 = vsyncpa [#allocation4 + $0x1], 0  ;;  %s1491_s21 = smov 0   ;;  %s1493_s22 = smov 0  }
   0xb   :  { %s1495_s23 = smov 0   ;;  %s1497_s24 = smov 0  }
   0xc LB: > { %s1512_s25 = sadd.s32 4294967295, %s1445_s24   ;;  %s972_s26 = sadd.s32 4294967294, %s1445_s24   ;;  %s1445_s24 = sphi %s1497_s24, %s1850_s24   ;;  %s1441_s23 = sphi %s1495_s23, %s1849_s23   ;;  %s1437_s22 = sphi %s1493_s22, %s1848_s22   ;;  %s1433_s21 = sphi %s1491_s21, %s1847_s21  }
   0xd   : > { %p46_p0 = scmp.ne.s32.totalorder %s1437_s22, %s1433_s21  ;;  %p1818_p1 = scmp.eq.s32.totalorder %s1512_s25, 0 }
   0xe   : > { %p186_p3 = scmp.eq.s32.totalorder %s972_s26, 3  ;;  %p973_p5 = scmp.ge.s32.totalorder %s1445_s24, 1 }
   0xf   : > { %p1521_p4 = por %p1818_p1, %p46_p0  ;;  %p193_p7 = scmp.lt.s32.totalorder %s1445_s24, 5 }
  0x10   : > { %p1526_p6 = por %p186_p3, %p46_p0  ;;  %s1447_s30 = smov [#allocation7]  }
  0x11   : > { %s1828_s27 = scalar_select %p1521_p4, 1, 0 }
  0x12   : > { %s1829_s28 = scalar_select %p1526_p6, 1, 0 }
  0x13   : > { %p1531_p8 = pnand %p973_p5, %p193_p7  ;;  %s205_s7 = sshll.u32 %s1447_s30, 4  ;;  %s206_s7 = int_to_ptr.vmem [resolvable:$true] %s205_s7 }
  0x14   : > { %s1448_s9 = smov [#allocation8]   ;;  %s1832_s2 = sld [smem:[#allocation17_spill]] }
  0x15   : > { %s1830_s29 = scalar_select %p1531_p8, 1, 0 }
  0x16   : > { %p1165_p9 = pneg %p1531_p8  ;;  %s221_s10 = sshll.u32 %s1448_s9, 4  ;;  %s1543_s10 = int_to_ptr.vmem [resolvable:$true] %s221_s10 }
  0x18   : > { %p1539_p10 = pnand %p1165_p9, %p1818_p1 }
  0x1a   : > { %s1251_s13 = scalar_lea.hbm %s1832_s2, 1024  ;;  %p1253_p12 = pneg %p1539_p10 }
  0x1b   : > { %p1252_p11 = scmp.ne.s32.totalorder %s1832_s2, %s1251_s13  ;;  %p1258_p3 = scmp.lt.u32.totalorder %s1251_s13, %s1832_s2 }
  0x1d   : > { %p1254_p13 = pnand %p1253_p12, %p1252_p11 }
  0x1f   : > { %p1255_p0 = pneg %p1254_p13 }
  0x21   : > { %p1260_p5 = pnand %p1258_p3, %p1255_p0 }
  0x23   : > { %1263 = shalt.err (!%p1260_p5)
}
  0x24   : > { %s1264_s18 = scalar_lea.vmem %s206_s7, 1024  ;;  %p1272_p2 = scmp.lt.s32.totalorder %s206_s7, %s206_s7 }
  0x25   : > { %p1265_p7 = scmp.ne.s32.totalorder %s206_s7, %s1264_s18  ;;  %p1273_p6 = scmp.lt.s32.totalorder %s1264_s18, %s1264_s18 }
  0x27   : > { %p1267_p9 = pnand %p1265_p7, %p1253_p12  ;;  %p1274_p4 = por %p1273_p6, %p1272_p2 }
  0x29   : > { %p1268_p1 = pneg %p1267_p9 }
  0x2b   : > { %p1275_p8 = pnand %p1274_p4, %p1268_p1 }
  0x2d   : > { %1278 = shalt.err (!%p1275_p8)
}
  0x2e   : > { %s1821_s19 = smov 64   ;;  %s1823_s20 = smov 4  }
  0x2f   : > { %1168 = dma.hbm_to_vmem [thread:$0]  (!%p1539_p10), %s1832_s2, 1024, %s206_s7, [#allocation6], %s1821_s19, %s1821_s19, %s1823_s20  }
  0x30   : > { %s1833_s4 = sld [smem:[#allocation18_spill]] }
  0x36   : > { %s1279_s12 = scalar_lea.hbm %s1833_s4, 1024 }
  0x37   : > { %p1280_p1 = scmp.ne.s32.totalorder %s1833_s4, %s1279_s12  ;;  %p1286_p6 = scmp.lt.u32.totalorder %s1279_s12, %s1833_s4 }
  0x39   : > { %p1282_p2 = pnand %p1280_p1, %p1253_p12 }
  0x3b   : > { %p1283_p4 = pneg %p1282_p2 }
  0x3d   : > { %p1288_p8 = pnand %p1286_p6, %p1283_p4 }
  0x3f   : > { %1291 = shalt.err (!%p1288_p8)
}
  0x40   : > { %s1292_s7 = scalar_lea.vmem %s1543_s10, 1024  ;;  %p1300_p3 = scmp.lt.s32.totalorder %s1543_s10, %s1543_s10 }
  0x41   : > { %p1293_p11 = scmp.ne.s32.totalorder %s1543_s10, %s1292_s7  ;;  %p1301_p5 = scmp.lt.s32.totalorder %s1292_s7, %s1292_s7 }
  0x43   : > { %p1295_p13 = pnand %p1293_p11, %p1253_p12  ;;  %p1302_p7 = por %p1301_p5, %p1300_p3 }
  0x45   : > { %p1296_p0 = pneg %p1295_p13 }
  0x47   : > { %p1303_p9 = pnand %p1302_p7, %p1296_p0 }
  0x49   : > { %1306 = shalt.err (!%p1303_p9)
}
  0x4a   : > { %1171 = dma.hbm_to_vmem [thread:$0]  (!%p1539_p10), %s1833_s4, 1024, %s1543_s10, [#allocation9], %s1821_s19, %s1821_s19, %s1823_s20  }
  0x4b   : > { %s1599_s8 = sadd.s32 1, %s1445_s24   ;;  %s33_s26 = sadd.s32 1, %s1441_s23 }
  0x4c   : > { %s30_s30 = ssub.s32 %s1445_s24, %s1599_s8  ;;  %p40_p12 = scmp.ne.s32.totalorder %s1441_s23, %s1437_s22 }
  0x4d   : > { %p31_p1 = scmp.eq.s32.totalorder %s30_s30, 0  ;;  %p41_p2 = scmp.eq.s32.totalorder %s1445_s24, 0 }
  0x4e   : > { %p1834_p4 = scmp.eq.s32.totalorder %s1512_s25, 3  ;;  %p1185_p8 = scmp.lt.s32.totalorder %s1445_s24, 4 }
  0x4f   : > { %s1615_s11 = scalar_select %p31_p1, %s1441_s23, %s33_s26  }
  0x50   : > { %p1609_p6 = por %p1834_p4, %p40_p12  ;;  %p42_p11 = por %p41_p2, %p40_p12 }
  0x51   : > { %s238_s12 = sand.u32 1, %s1441_s23   ;;  %s1028_s10 = sshll.u32 %s1445_s24, 9 }
  0x52   : > { %s977_s13 = sshll.u32 %s238_s12, 5  ;;  %s1836_s0 = sld [smem:[#allocation16_spill]] }
  0x53   : > { %s242_s7 = scalar_lea.vmem [#allocation2], %s977_s13  ;;  %p1626_p10 = pnand %p1185_p8, %p42_p11 }
  0x54   : > { %s249_s17 = sshll.u32 %s242_s7, 4  ;;  %s1633_s14 = scalar_lea.hbm %s1812_s1, %s1028_s10  ;;  %s1624_s17 = int_to_ptr.vmem [resolvable:$true] %s249_s17 }
  0x55   : > { %s263_s15 = scalar_lea.vmem [#allocation5], %s977_s13  ;;  %s1637_s20 = scalar_lea.sflag [#allocation3], %s238_s12 }
  0x56   : > { %s1635_s19 = sshll.u32 %s263_s15, 4  ;;  %p1309_p0 = pneg %p1626_p10  ;;  %s1669_s19 = int_to_ptr.vmem [resolvable:$true] %s1635_s19 }
  0x58   : > { %s1622_s16 = scalar_lea.hbm %s1836_s0, %s1028_s10  ;;  %s1312_s26 = scalar_lea.hbm %s1836_s0, 2048 }
  0x59   : > { %s1307_s7 = scalar_lea.hbm %s1622_s16, 512  ;;  %p1313_p7 = scmp.lt.u32.totalorder %s1622_s16, %s1836_s0 }
  0x5a   : > { %p1308_p13 = scmp.ne.s32.totalorder %s1622_s16, %s1307_s7  ;;  %p1314_p9 = scmp.lt.u32.totalorder %s1312_s26, %s1307_s7 }
  0x5b   : > { %p1316_p1 = scmp.lt.u32.totalorder %s1307_s7, %s1622_s16 }
  0x5c   : > { %p1310_p3 = pnand %p1309_p0, %p1308_p13  ;;  %p1315_p12 = por %p1314_p9, %p1313_p7 }
  0x5e   : > { %p1311_p5 = pneg %p1310_p3  ;;  %p1317_p2 = por %p1316_p1, %p1315_p12 }
  0x60   : > { %p1318_p4 = pnand %p1317_p2, %p1311_p5 }
  0x62   : > { %1321 = shalt.err (!%p1318_p4)
}
  0x63   : > { %s1322_s12 = scalar_lea.vmem %s1624_s17, 512  ;;  %s1451_s2 = smov [#allocation2]  }
  0x64   : > { %p1323_p8 = scmp.ne.s32.totalorder %s1624_s17, %s1322_s12  ;;  %s1327_s4 = sshll.u32 %s1451_s2, 4  ;;  %s1328_s4 = int_to_ptr.vmem [resolvable:$false] %s1327_s4 }
  0x65   : > { %s1329_s13 = scalar_lea.vmem %s1328_s4, 1024  ;;  %p1330_p3 = scmp.lt.s32.totalorder %s1624_s17, %s1328_s4 }
  0x66   : > { %p1325_p11 = pnand %p1323_p8, %p1309_p0  ;;  %p1331_p7 = scmp.lt.s32.totalorder %s1329_s13, %s1322_s12 }
  0x68   : > { %p1326_p13 = pneg %p1325_p11  ;;  %p1332_p9 = por %p1331_p7, %p1330_p3 }
  0x6a   : > { %p1333_p12 = pnand %p1332_p9, %p1326_p13 }
  0x6c   : > { %1336 = shalt.err (!%p1333_p12)
}
  0x6d   : > { %s1838_s15 = smov 4   ;;  %s1839_s7 = smov 64  }
  0x6e   : > { %1175 = dma.hbm_to_vmem [thread:$0]  (!%p1626_p10), %s1622_s16, 512, %s1624_s17, %s1637_s20, %s1839_s7, %s1839_s7, %s1838_s15  }
  0x6f   : > { %s259_s26 = sand.u32 1, %s1445_s24   ;;  %s1337_s10 = scalar_lea.hbm %s1633_s14, 512 }
  0x70   : > { %s1672_s30 = scalar_lea.sflag [#allocation6], %s259_s26  ;;  %p1338_p5 = scmp.ne.s32.totalorder %s1633_s14, %s1337_s10 }
  0x71   : > { %s1342_s4 = scalar_lea.hbm %s1812_s1, 2048  ;;  %p1343_p4 = scmp.lt.u32.totalorder %s1633_s14, %s1812_s1 }
  0x72   : > { %p1340_p1 = pnand %p1338_p5, %p1309_p0  ;;  %p1344_p8 = scmp.lt.u32.totalorder %s1342_s4, %s1337_s10 }
  0x73   : > { %p1346_p13 = scmp.lt.u32.totalorder %s1337_s10, %s1633_s14 }
  0x74   : > { %p1341_p2 = pneg %p1340_p1  ;;  %p1345_p11 = por %p1344_p8, %p1343_p4 }
  0x76   : > { %p1347_p3 = por %p1346_p13, %p1345_p11 }
  0x78   : > { %p1348_p7 = pnand %p1347_p3, %p1341_p2 }
  0x7a   : > { %1351 = shalt.err (!%p1348_p7)
}
  0x7b   : > { %s1352_s20 = scalar_lea.vmem %s1669_s19, 512  ;;  %s1452_s16 = smov [#allocation5]  }
  0x7c   : > { %p1353_p9 = scmp.ne.s32.totalorder %s1669_s19, %s1352_s20  ;;  %s1357_s17 = sshll.u32 %s1452_s16, 4  ;;  %s1358_s17 = int_to_ptr.vmem [resolvable:$false] %s1357_s17 }
  0x7d   : > { %s1359_s0 = scalar_lea.vmem %s1358_s17, 1024  ;;  %p1360_p1 = scmp.lt.s32.totalorder %s1669_s19, %s1358_s17 }
  0x7e   : > { %p1355_p12 = pnand %p1353_p9, %p1309_p0  ;;  %p1361_p4 = scmp.lt.s32.totalorder %s1359_s0, %s1352_s20 }
  0x80   : > { %p1356_p5 = pneg %p1355_p12  ;;  %p1362_p8 = por %p1361_p4, %p1360_p1 }
  0x82   : > { %p1363_p11 = pnand %p1362_p8, %p1356_p5 }
  0x84   : > { %1366 = shalt.err (!%p1363_p11)
}
  0x85   : > { %1178 = dma.hbm_to_vmem [thread:$0]  (!%p1626_p10), %s1633_s14, 512, %s1669_s19, %s1672_s30, %s1839_s7, %s1839_s7, %s1838_s15  }
  0x86   : > { %p1840_p0 = scmp.ne.s32.totalorder %s1830_s29, 0 }
  0x87   : > { %s1704_s26 = sand.u32 (!%p1840_p0), 1, %s1437_s22   ;;  %p1841_p2 = scmp.ne.s32.totalorder (!%p1840_p0), %s1828_s27, 0 }
  0x88   : > { %282 = sbr.rel (%p1840_p0) target bundleno = 1083 (0x43b), region = 44  ;;  %s984_s10 = sshll.u32 (!%p1840_p0), %s1704_s26, 5 }
  0x89   : > { %s285_s12 = scalar_lea.sflag (!%p1840_p0), [#allocation3], %s1704_s26  ;;  %s1708_s2 = scalar_lea.vmem (!%p1840_p0), [#allocation2], %s984_s10 }
  0x8f   : > { %1412 = dma.done.wait (%p1841_p2), %s285_s12, 512  }
  0x90   : > { %1414 = vsyncadd (%p1841_p2), %s285_s12, 4294966784  ;;  %s293_s19 = sand.u32 1, %s1512_s25   ;;  %s297_s18 = scalar_lea.vmem [#allocation5], %s984_s10 }
  0x91   : > { %s294_s29 = scalar_lea.sflag [#allocation6], %s293_s19 }
  0x92   : > { %1416 = dma.done.wait (%p1841_p2), %s294_s29, 512  }
  0x93   : > { %1418 = vsyncadd (%p1841_p2), %s294_s29, 4294966784  ;;  %p1842_p10 = scmp.eq.s32.totalorder %s1512_s25, 0 }
  0x95   : > { %1420 = dma.done.wait (%p1842_p10), [#allocation6], 1024   ;;  %p1843_p13 = pmov %p1842_p10 }
  0x96   : > { %p1844_p3 = pmov %p1842_p10 }
  0x97   : > { %1422 = vsyncadd (%p1843_p13), [#allocation6], 4294966272 }
  0x98   : > { %1424 = dma.done.wait (%p1844_p3), [#allocation9], 1024   ;;  %p1845_p7 = pmov %p1844_p3 }
  0x99   : > { %v1227_v0 = vld [vmem:[%s297_s18] sm:$0xff]   ;;  %v1228_v1 = vld [vmem:[%s297_s18 + $0x8] sm:$0xff]   ;;  %v1229_v2 = vld [vmem:[%s297_s18 + $0x10] sm:$0xff]   ;;  %vm400_vm0 = vcmask 523264   ;;  %s988_s15 = sshll.u32 %s1704_s26, 6  ;;  %s1030_s20 = sshll.u32 %s1512_s25, 10 }
  0x9a   : > { %1426 = vsyncadd (%p1845_p7), [#allocation9], 4294966272  ;;  %1071 = vmatprep.subr.bf16.mxu0 %v1227_v0  ;;  %v1728_v3 = vld [vmem:[%s1708_s2] sm:$0xff]   ;;  %v1230_v4 = vld [vmem:[%s297_s18 + $0x18] sm:$0xff]   ;;  %s338_s4 = scalar_lea.vmem [#allocation10], %s988_s15  ;;  %s1768_s0 = scalar_lea.hbm %s1817_s6, %s1030_s20 }
  0x9b   : > { %1072 = vmatpush3.bf16.msra.mxu0 %v1227_v0  ;;  %1079 = vmatprep.mubr.msk.bf16.mxu0 %vm400_vm0, %v1728_v3  ;;  %v1235_v5 = vld [vmem:[#allocation7] sm:$0xff]   ;;  %v1236_v6 = vld [vmem:[#allocation7 + $0x8] sm:$0xff]   ;;  %v1237_v8 = vld [vmem:[#allocation7 + $0x10] sm:$0xff]   ;;  %s857_s13 = sshll.u32 %s338_s4, 4  ;;  %s844_s25 = scalar_lea.sflag [#allocation4], %s1704_s26  ;;  %s1763_s13 = int_to_ptr.vmem [resolvable:$true] %s857_s13 }
  0x9c   : > { %1073 = vmatprep.subr.bf16.mxu0 %v1228_v1  ;;  %1087 = vmatprep.subr.bf16.mxu1 %v1235_v5  ;;  %v1733_v7 = vld [vmem:[%s1708_s2 + $0x8] sm:$0xff]   ;;  %v1736_v9 = vld [vmem:[%s1708_s2 + $0x10] sm:$0xff]   ;;  %v1238_v10 = vld [vmem:[#allocation7 + $0x18] sm:$0xff]   ;;  %s1367_s10 = scalar_lea.vmem %s1763_s13, 1024  ;;  %s1453_s12 = smov [#allocation10]  }
  0x9d   : > { %1088 = vmatpush3.bf16.msra.mxu1 %v1235_v5  ;;  %v1239_v11 = vld [vmem:[#allocation7 + $0x20] sm:$0xff]   ;;  %v1743_v12 = vld [vmem:[%s1708_s2 + $0x18] sm:$0xff]   ;;  %v1240_v13 = vld [vmem:[#allocation7 + $0x28] sm:$0xff]   ;;  %p1368_p9 = scmp.ne.s32.totalorder %s1763_s13, %s1367_s10  ;;  %s1371_s2 = sshll.u32 %s1453_s12, 4  ;;  %s1372_s2 = int_to_ptr.vmem [resolvable:$false] %s1371_s2 }
  0x9e   : > { %1089 = vmatprep.subr.bf16.mxu1 %v1236_v6  ;;  %v1241_v14 = vld [vmem:[#allocation7 + $0x30] sm:$0xff]   ;;  %v1242_v15 = vld [vmem:[#allocation7 + $0x38] sm:$0xff]   ;;  %v1243_v16 = vld [vmem:[#allocation8] sm:$0xff]   ;;  %s1373_s19 = scalar_lea.vmem %s1372_s2, 2048  ;;  %p1374_p1 = scmp.lt.s32.totalorder %s1763_s13, %s1372_s2 }
  0x9f   : > { %1074 = vmatpush3.bf16.msra.mxu0 %v1228_v1  ;;  %v1244_v17 = vld [vmem:[#allocation8 + $0x8] sm:$0xff]   ;;  %v1245_v18 = vld [vmem:[#allocation8 + $0x10] sm:$0xff]   ;;  %v1246_v19 = vld [vmem:[#allocation8 + $0x18] sm:$0xff]   ;;  %p1369_p12 = pnand %p1368_p9, %p1609_p6  ;;  %p1375_p4 = scmp.lt.s32.totalorder %s1373_s19, %s1367_s10 }
  0xa0   : > { %1075 = vmatprep.subr.bf16.mxu0 %v1229_v2  ;;  %v1247_v20 = vld [vmem:[#allocation8 + $0x20] sm:$0xff]   ;;  %v1248_v21 = vld [vmem:[#allocation8 + $0x28] sm:$0xff]   ;;  %v1249_v34 = vld [vmem:[#allocation8 + $0x30] sm:$0xff]  }
  0xa1   : > { %1090 = vmatpush3.bf16.msra.mxu1 %v1236_v6  ;;  %v1250_v35 = vld [vmem:[#allocation8 + $0x38] sm:$0xff]   ;;  %v1001_v36 = vld [vmem:[%s1814_s3] ss:$0 sm:$0xff]  ;;  %p1370_p5 = pneg %p1369_p12  ;;  %p1376_p8 = por %p1375_p4, %p1374_p1 }
  0xa2   : > { %1091 = vmatprep.subr.bf16.mxu1 %v1237_v8 }
  0xa3   : > { %1076 = vmatpush3.bf16.msra.mxu0 %v1229_v2  ;;  %p1377_p11 = pnand %p1376_p8, %p1370_p5 }
  0xa4   : > { %1077 = vmatprep.subr.bf16.mxu0 %v1230_v4 }
  0xa5   : > { %1092 = vmatpush3.bf16.msra.mxu1 %v1237_v8 }
  0xa6   : > { %1093 = vmatprep.subr.bf16.mxu1 %v1238_v10 }
  0xa7   : > { %1078 = vmatpush3.bf16.msra.mxu0 %v1230_v4 }
  0xa8   : > { %1111 = vmatprep.subr.bf16.mxu0 %v1243_v16 }
  0xa9   : > { %1094 = vmatpush3.bf16.msra.mxu1 %v1238_v10 }
  0xaa   : > { %1080 = vmatmul.mubr.msk.bf16.vlgmr.msra.gmra.mrb[0].mxu0 %vm400_vm0, %v1733_v7  ;;  %1095 = vmatprep.subr.bf16.mxu1 %v1239_v11 }
  0xab   : > { %1083 = vmatprep.mubr.msk.bf16.mxu0 %vm400_vm0, %v1736_v9  ;;  %1112 = vmatpush3.bf16.msra.mxu0 %v1243_v16  ;;  %v1018_v16 = vld [vmem:[%s1816_s5] ss:$0 sm:$0xff] }
  0xac   : > { %1113 = vmatprep.subr.bf16.mxu0 %v1244_v17 }
  0xad   : > { %1096 = vmatpush3.bf16.msra.mxu1 %v1239_v11 }
  0xae   : > { %1097 = vmatprep.subr.bf16.mxu1 %v1240_v13 }
  0xaf   : > { %1114 = vmatpush3.bf16.msra.mxu0 %v1244_v17 }
  0xb0   : > { %1115 = vmatprep.subr.bf16.mxu0 %v1245_v18 }
  0xb1   : > { %1098 = vmatpush3.bf16.msra.mxu1 %v1240_v13 }
  0xb2   : > { %1084 = vmatmul.mubr.msk.bf16.gmra.mrb[4].mxu0 %vm400_vm0, %v1743_v12  ;;  %1099 = vmatprep.subr.bf16.mxu1 %v1241_v14 }
  0xb3   : > { %1116 = vmatpush3.bf16.msra.mxu0 %v1245_v18 }
  0xb4   : > { %1117 = vmatprep.subr.bf16.mxu0 %v1246_v19 }
  0xb5   : > { %1100 = vmatpush3.bf16.msra.mxu1 %v1241_v14 }
  0xb6   : > { %1101 = vmatprep.subr.bf16.mxu1 %v1242_v15 }
  0xb7   : > { %1118 = vmatpush3.bf16.msra.mxu0 %v1246_v19 }
  0xb8   : > { %1119 = vmatprep.subr.bf16.mxu0 %v1247_v20 }
  0xb9   : > { %1102 = vmatpush3.bf16.msra.mxu1 %v1242_v15 }
  0xbb   : > { %1120 = vmatpush3.bf16.msra.mxu0 %v1247_v20 }
  0xbc   : > { %1121 = vmatprep.subr.bf16.mxu0 %v1248_v21 }
  0xbf   : > { %1122 = vmatpush3.bf16.msra.mxu0 %v1248_v21 }
  0xc0   : > { %1123 = vmatprep.subr.bf16.mxu0 %v1249_v34 }
  0xc3   : > { %1124 = vmatpush3.bf16.msra.mxu0 %v1249_v34 }
  0xc4   : > { %1125 = vmatprep.subr.bf16.mxu0 %v1250_v35 }
  0xc7   : > { %1126 = vmatpush3.bf16.msra.mxu0 %v1250_v35 }
 0x17d   : > { %v1081_v22 = vpop.f32.mrb[0].mxu0 }
 0x17e   : > { %v447_v23 = vpop.f32.mrb[1].mxu0 }
 0x17f   : > { %v1082_v24 = vpop.f32.mrb[2].mxu0 }
 0x180   : > { %v479_v25 = vpack.c.bf16 %v1082_v24, %v1081_v22  ;;  %v450_v26 = vpop.f32.mrb[3].mxu0 }
 0x181   : > { %v478_v27 = vpack.c.bf16 %v450_v26, %v447_v23 }
 0x183   : > { %1103 = vmatprep.mubr.bf16.mxu1 %v478_v27 }
 0x184   : > { %1104 = vmatmul.mubr.bf16.vlgmr.msra.gmra.mrb[0].mxu1 %v479_v25 }
 0x185   : > { %v1085_v28 = vpop.f32.mrb[4].mxu0 }
 0x186   : > { %v463_v29 = vpop.f32.mrb[5].mxu0 }
 0x187   : > { %v1086_v30 = vpop.f32.mrb[6].mxu0 }
 0x188   : > { %v481_v31 = vpack.c.bf16 %v1086_v30, %v1085_v28  ;;  %v466_v32 = vpop.f32.mrb[7].mxu0 }
 0x189   : > { %v480_v33 = vpack.c.bf16 %v466_v32, %v463_v29 }
 0x18b   : > { %1107 = vmatprep.mubr.bf16.mxu1 %v480_v33 }
 0x18c   : > { %1108 = vmatmul.mubr.bf16.gmra.mrb[4].mxu1 %v481_v31 }
 0x18d   : > { %1143 = vmatprep.mubr.msk.bf16.mxu1 %vm400_vm0, %v1728_v3 }
 0x257   : > { %v1105_v37 = vpop.f32.mrb[0].mxu1 }
 0x258   : > { %v596_v38 = vadd.f32 %v1105_v37, %v1001_v36  ;;  %v587_v39 = vpop.f32.mrb[1].mxu1 }
 0x259   : > { %v588_v40 = vadd.f32 %v1001_v36, %v587_v39  ;;  %v1106_v41 = vpop.f32.mrb[2].mxu1 }
 0x25a   : > { %v599_v42 = vadd.f32 %v1106_v41, %v1001_v36  ;;  %v590_v43 = vpop.f32.mrb[3].mxu1  ;;  %v620_v45 = vmax.f32 %v596_v38, 0.0 }
 0x25b   : > { %v591_v44 = vadd.f32 %v1001_v36, %v590_v43  ;;  %v618_v47 = vmax.f32 %v588_v40, 0.0 }
 0x25c   : > { %v621_v46 = vmax.f32 %v599_v42, 0.0 }
 0x25d   : > { %v619_v48 = vmax.f32 %v591_v44, 0.0 }
 0x25e   : > { %v627_v49 = vpack.c.bf16 %v621_v46, %v620_v45 }
 0x25f   : > { %v626_v50 = vpack.c.bf16 %v619_v48, %v618_v47  ;;  %v1109_v51 = vpop.f32.mrb[4].mxu1 }
 0x260   : > { %v612_v52 = vadd.f32 %v1109_v51, %v1001_v36  ;;  %v603_v53 = vpop.f32.mrb[5].mxu1 }
 0x261   : > { %v604_v54 = vadd.f32 %v1001_v36, %v603_v53  ;;  %v1110_v55 = vpop.f32.mrb[6].mxu1  ;;  %1127 = vmatprep.mubr.bf16.mxu0 %v626_v50 }
 0x262   : > { %v615_v56 = vadd.f32 %v1110_v55, %v1001_v36  ;;  %v606_v57 = vpop.f32.mrb[7].mxu1  ;;  %1128 = vmatmul.mubr.bf16.vlgmr.msra.gmra.mrb[8].mxu0 %v627_v49  ;;  %v624_v59 = vmax.f32 %v612_v52, 0.0 }
 0x263   : > { %v607_v58 = vadd.f32 %v1001_v36, %v606_v57  ;;  %v622_v61 = vmax.f32 %v604_v54, 0.0 }
 0x264   : > { %v625_v60 = vmax.f32 %v615_v56, 0.0 }
 0x265   : > { %v623_v62 = vmax.f32 %v607_v58, 0.0 }
 0x266   : > { %v629_v63 = vpack.c.bf16 %v625_v60, %v624_v59 }
 0x267   : > { %v628_v0 = vpack.c.bf16 %v623_v62, %v622_v61 }
 0x269   : > { %1131 = vmatprep.mubr.bf16.mxu0 %v628_v0 }
 0x26a   : > { %1132 = vmatmul.mubr.bf16.gmra.mrb[12].mxu0 %v629_v63 }
 0x335   : > { %v1129_v1 = vpop.f32.mrb[8].mxu0 }
 0x336   : > { %v728_v2 = vpop.f32.mrb[9].mxu0 }
 0x337   : > { %v1130_v3 = vpop.f32.mrb[10].mxu0 }
 0x338   : > { %v760_v4 = vpack.c.bf16 %v1130_v3, %v1129_v1  ;;  %v731_v5 = vpop.f32.mrb[11].mxu0 }
 0x339   : > { %v759_v6 = vpack.c.bf16 %v731_v5, %v728_v2 }
 0x33b   : > { %1135 = vmatprep.subr.bf16.mxu1 %v759_v6 }
 0x33c   : > { %1136 = vmatpush3.bf16.msra.mxu1 %v759_v6 }
 0x33d   : > { %v1133_v8 = vpop.f32.mrb[12].mxu0  ;;  %1137 = vmatprep.subr.bf16.mxu1 %v760_v4 }
 0x33e   : > { %v744_v10 = vpop.f32.mrb[13].mxu0 }
 0x33f   : > { %v1134_v11 = vpop.f32.mrb[14].mxu0 }
 0x340   : > { %v762_v13 = vpack.c.bf16 %v1134_v11, %v1133_v8  ;;  %v747_v14 = vpop.f32.mrb[15].mxu0  ;;  %1138 = vmatpush3.bf16.msra.mxu1 %v760_v4 }
 0x341   : > { %v761_v15 = vpack.c.bf16 %v747_v14, %v744_v10 }
 0x343   : > { %1139 = vmatprep.subr.bf16.mxu1 %v761_v15 }
 0x344   : > { %1140 = vmatpush3.bf16.msra.mxu1 %v761_v15 }
 0x345   : > { %1141 = vmatprep.subr.bf16.mxu1 %v762_v13 }
 0x348   : > { %1142 = vmatpush3.bf16.msra.mxu1 %v762_v13 }
 0x34b   : > { %1144 = vmatmul.mubr.msk.bf16.vlgmr.msra.gmra.mrb[8].mxu1 %vm400_vm0, %v1733_v7 }
 0x34c   : > { %1147 = vmatprep.mubr.msk.bf16.mxu1 %vm400_vm0, %v1736_v9 }
 0x353   : > { %1148 = vmatmul.mubr.msk.bf16.gmra.mrb[12].mxu1 %vm400_vm0, %v1743_v12 }
 0x41e   : > { %v1145_v17 = vpop.f32.mrb[8].mxu1 }
 0x41f   : > { %v813_v18 = vadd.f32 %v1145_v17, %v1018_v16  ;;  %v804_v19 = vpop.f32.mrb[9].mxu1 }
 0x420   : > { %v805_v20 = vadd.f32 %v1018_v16, %v804_v19  ;;  %v1146_v21 = vpop.f32.mrb[10].mxu1 }
 0x421   : > { %837 = vst [vmem:[%s338_s4 + $0x10] sm:$0xff] %v813_v18  ;;  %v816_v7 = vadd.f32 %v1146_v21, %v1018_v16  ;;  %v807_v22 = vpop.f32.mrb[11].mxu1 }
 0x422   : > { %835 = vst [vmem:[%s338_s4] sm:$0xff] %v805_v20  ;;  %v808_v9 = vadd.f32 %v1018_v16, %v807_v22 }
 0x423   : > { %838 = vst [vmem:[%s338_s4 + $0x18] sm:$0xff] %v816_v7 }
 0x424   : > { %836 = vst [vmem:[%s338_s4 + $0x8] sm:$0xff] %v808_v9 }
 0x426   : > { %v1149_v12 = vpop.f32.mrb[12].mxu1 }
 0x427   : > { %v829_v23 = vadd.f32 %v1149_v12, %v1018_v16  ;;  %v820_v24 = vpop.f32.mrb[13].mxu1 }
 0x428   : > { %v821_v25 = vadd.f32 %v1018_v16, %v820_v24  ;;  %v1150_v26 = vpop.f32.mrb[14].mxu1 }
 0x429   : > { %841 = vst [vmem:[%s338_s4 + $0x30] sm:$0xff] %v829_v23  ;;  %v832_v27 = vadd.f32 %v1150_v26, %v1018_v16  ;;  %v823_v28 = vpop.f32.mrb[15].mxu1 }
 0x42a   : > { %839 = vst [vmem:[%s338_s4 + $0x20] sm:$0xff] %v821_v25  ;;  %v824_v29 = vadd.f32 %v1018_v16, %v823_v28 }
 0x42b   : > { %842 = vst [vmem:[%s338_s4 + $0x38] sm:$0xff] %v832_v27 }
 0x42c   : > { %840 = vst [vmem:[%s338_s4 + $0x28] sm:$0xff] %v824_v29 }
 0x42d   : > { %1380 = shalt.err (!%p1377_p11)
}
 0x42e   : > { %s1381_s29 = scalar_lea.hbm %s1768_s0, 1024  ;;  %s1385_s14 = scalar_lea.hbm %s1817_s6, 4096 }
 0x42f   : > { %p1382_p0 = scmp.ne.s32.totalorder %s1768_s0, %s1381_s29  ;;  %p1386_p13 = scmp.lt.u32.totalorder %s1768_s0, %s1817_s6 }
 0x430   : > { %p1387_p3 = scmp.lt.u32.totalorder %s1385_s14, %s1381_s29  ;;  %p1389_p9 = scmp.lt.u32.totalorder %s1381_s29, %s1768_s0 }
 0x431   : > { %p1383_p2 = pnand %p1382_p0, %p1609_p6 }
 0x432   : > { %p1388_p7 = por %p1387_p3, %p1386_p13 }
 0x433   : > { %p1384_p10 = pneg %p1383_p2 }
 0x434   : > { %p1390_p12 = por %p1389_p9, %p1388_p7 }
 0x436   : > { %p1391_p5 = pnand %p1390_p12, %p1384_p10 }
 0x438   : > { %1394 = shalt.err (!%p1391_p5)
}
 0x439   : > { %s1454_s30 = smov 128   ;;  %s1455_s4 = smov 8  }
 0x43a   : > { %1163 = dma.vmem_to_hbm [thread:$0]  (%p1609_p6), %s1763_s13, 1024, %s1768_s0, %s844_s25, %s1454_s30, %s1454_s30, %s1455_s4  }
 0x43b PF: > { %p1188_p1 = scmp.ge.s32.totalorder %s1445_s24, 2  ;;  %s872_s20 = sand.u32 1, %s1433_s21  }
 0x43c   : > { %p1846_p4 = scmp.ne.s32.totalorder %s1829_s28, 0  ;;  %s873_s16 = scalar_lea.sflag [#allocation4], %s872_s20 }
 0x43e   : > { %p1180_p8 = pnand %p1188_p1, %p1846_p4 }
 0x440   : > { %1428 = dma.done.wait (!%p1180_p8), %s873_s16, 1024  }
 0x441   : > { %1430 = vsyncadd (!%p1180_p8), %s873_s16, 4294966272  ;;  %p23_p11 = scmp.ge.s32.totalorder %s1599_s8, 6   ;;  %s1847_s21 = smov %s1437_s22 }
 0x442   : > { %s1848_s22 = smov %s1441_s23  ;;  %s1849_s23 = smov %s1615_s11 }
 0x443   : > { %s1850_s24 = smov %s1599_s8  ;;  %25 = sbr.rel (!%p23_p11) target bundleno = 12 (0xc), region = 110 }
 0x44a   :  { %878 = vsyncpa [#allocation3], 1 }
 0x44b   :  { %880 = vsyncpa [#allocation3 + $0x1], 1 }
 0x44c   :  { %881 = vsyncpa [#allocation6], 1 }
 0x44d   :  { %883 = vsyncpa [#allocation6 + $0x1], 1 }
 0x44e   :  { %884 = vsyncpa [#allocation9], 1 }
 0x44f   :  { %885 = vsyncpa [#allocation4], 1 }
 0x450   :  { %887 = vsyncpa [#allocation4 + $0x1], 1 }

</bundles_post_ra>
